<compile_context>
chip_gen: v6e
topology: v6e:2x2x1
jax: 0.10.0
libtpu: 0.0.40
codegen_flags: <defaults>
</compile_context>

<pallas_src>
import jax
import jax.numpy as jnp
from jax.experimental import pallas as pl
from jax.experimental.pallas import tpu as pltpu

HIDDEN1 = 128
HIDDEN2 = 256
OUT_PAD = 128            # lane-dense padded output width
LEAKY_SLOPE = 0.01       # PyTorch nn.LeakyReLU default


def _round_up(x, m):
    return ((x + m - 1) // m) * m


def _leaky_relu(x, slope=LEAKY_SLOPE):
    # maximum(x, slope*x) == LeakyReLU for 0 < slope < 1; 2 VALU ops vs 3.
    return jnp.maximum(x, slope * x)


def _device_kind():
    try:
        return jax.devices()[0].device_kind.lower()
    except Exception:
        return ""


def _is_v7x():
    return "7" in _device_kind()


def _tile_budget():
    """(max batch tile, vmem_limit_bytes) per TPU generation."""
    if _is_v7x():
        # v7x: 64 MiB physical VMEM per TC -> smaller tile, modest scoped raise.
        return 2048, 48 * 1024 * 1024
    # v5e / v6e: 128 MiB physical VMEM -> big tile to amortize per-step overhead.
    return 4096, 64 * 1024 * 1024


def policy_net_kernel(x_ref, w1_ref, b1_ref, w2_ref, b2_ref, w3_ref, b3_ref, o_ref):
    # bf16 operands into the MXU, f32 accumulation, f32 bias/activation math.
    x = x_ref[...]                                                     # already bf16

    h1 = jnp.dot(x, w1_ref[...], preferred_element_type=jnp.float32) + b1_ref[...]
    h1 = _leaky_relu(h1).astype(jnp.bfloat16)

    h2 = jnp.dot(h1, w2_ref[...], preferred_element_type=jnp.float32) + b2_ref[...]
    h2 = _leaky_relu(h2).astype(jnp.bfloat16)

    z = jnp.dot(h2, w3_ref[...], preferred_element_type=jnp.float32) + b3_ref[...]
    # 2*sigmoid(a) - 1 == tanh(a/2); the 0.5 is folded into w3/b3 at init time,
    # so this is a single EUP transcendental + lane-dense bf16 store.
    o_ref[...] = jnp.tanh(z).astype(o_ref.dtype)


def _run_pallas(x_p, w1, b1, w2, b2, w3, b3, *, tb, grid, state_dim, out_pad,
                vmem_limit, use_fast_config):
    pb = x_p.shape[0]

    def const_spec(shape):
        # Constant index map -> block fetched once and kept resident in VMEM.
        if use_fast_config:
            return pl.BlockSpec(shape, lambda i: (0, 0), pipeline_mode=pl.Buffered(1))
        return pl.BlockSpec(shape, lambda i: (0, 0))

    if use_fast_config and _is_v7x():
        batch_sem = pltpu.CORE_PARALLEL      # shard batch tiles across both TCs
    else:
        batch_sem = "parallel"

    weight_bytes = sum(int(a.size) * a.dtype.itemsize for a in (w1, b1, w2, b2, w3, b3))
    cost = pl.CostEstimate(
        flops=2 * pb * (state_dim * HIDDEN1 + HIDDEN1 * HIDDEN2 + HIDDEN2 * out_pad),
        transcendentals=pb * out_pad,
        bytes_accessed=int(x_p.size) * x_p.dtype.itemsize      # bf16 x
        + pb * out_pad * 2                                     # bf16 padded out
        + weight_bytes,
    )

    return pl.pallas_call(
        policy_net_kernel,
        out_shape=jax.ShapeDtypeStruct((pb, out_pad), jnp.bfloat16),
        grid_spec=pltpu.PrefetchScalarGridSpec(
            num_scalar_prefetch=0,
            grid=grid,
            in_specs=[
                # Activations: tiled over the batch axis (double-buffered by Pallas).
                pl.BlockSpec((tb, state_dim), lambda i: (i, 0)),
                # Weights / biases: resident in VMEM for the whole grid.
                const_spec(w1.shape), const_spec(b1.shape),
                const_spec(w2.shape), const_spec(b2.shape),
                const_spec(w3.shape), const_spec(b3.shape),
            ],
            out_specs=pl.BlockSpec((tb, out_pad), lambda i: (i, 0)),
        ),
        compiler_params=pltpu.CompilerParams(
            dimension_semantics=(batch_sem,),
            vmem_limit_bytes=vmem_limit,
        ),
        cost_estimate=cost,
    )(x_p, w1, b1, w2, b2, w3, b3)


def policy_net_forward(x, params, action_dim):
    """x: [batch, state_dim] float32; params from init_params. Returns [batch, action_dim] f32."""
    w1, b1, w2, b2, w3, b3 = (params[k] for k in ("w1", "b1", "w2", "b2", "w3", "b3"))
    batch, state_dim = x.shape
    out_pad = w3.shape[1]

    # bf16 at the boundary: halves x DMA/VMEM bytes; numerics unchanged (the kernel
    # always rounded x to bf16 before the first matmul anyway).
    x = x.astype(jnp.bfloat16)

    # Pad batch to a sublane-aligned multiple of the batch tile.
    tb_max, vmem_limit = _tile_budget()
    pb = _round_up(max(batch, 8), 8)
    tb = min(tb_max, pb)
    pb = _round_up(pb, tb)
    if pb != batch:
        x = jnp.pad(x, ((0, pb - batch), (0, 0)))
    grid = (pb // tb,)

    kwargs = dict(tb=tb, grid=grid, state_dim=state_dim, out_pad=out_pad,
                  vmem_limit=vmem_limit)
    try:
        out = _run_pallas(x, w1, b1, w2, b2, w3, b3, use_fast_config=True, **kwargs)
    except Exception:
        # Fallback: default double-buffered weight specs + plain "parallel" semantics.
        out = _run_pallas(x, w1, b1, w2, b2, w3, b3, use_fast_config=False, **kwargs)

    # Padded rows/columns hold tanh(bias) garbage by construction; slice them away.
    # The slice result is tiny (batch x action_dim), so the f32 cast is negligible.
    return out[:batch, :action_dim].astype(jnp.float32)


def init_params(key, state_dim, action_dim):
    """PyTorch-Linear-style init (uniform +-1/sqrt(fan_in)); weights bf16, biases f32.

    Notes for porting real PyTorch weights:
      * PyTorch stores Linear weights as [out, in]; transpose to [in, out].
      * fc3 weight/bias must be scaled by 0.5 (the kernel computes tanh(z) and
        relies on 2*sigmoid(a)-1 == tanh(a/2) with the 0.5 folded into w3/b3).
      * w3/b3 are zero-padded to OUT_PAD output columns for a lane-dense store.
    """
    assert 0 < action_dim <= OUT_PAD, f"action_dim must be in (0, {OUT_PAD}]"
    ks = jax.random.split(key, 6)

    def linear(kw, kb, fan_in, fan_out):
        bound = 1.0 / jnp.sqrt(jnp.float32(fan_in))
        w = jax.random.uniform(kw, (fan_in, fan_out), jnp.float32, -bound, bound)
        b = jax.random.uniform(kb, (1, fan_out), jnp.float32, -bound, bound)
        return w, b

    w1, b1 = linear(ks[0], ks[1], state_dim, HIDDEN1)
    w2, b2 = linear(ks[2], ks[3], HIDDEN1, HIDDEN2)
    w3, b3 = linear(ks[4], ks[5], HIDDEN2, action_dim)

    # Fold the 0.5 of tanh(z/2) into the last layer, then pad lane-dense.
    w3 = jnp.pad(0.5 * w3, ((0, 0), (0, OUT_PAD - action_dim)))
    b3 = jnp.pad(0.5 * b3, ((0, 0), (0, OUT_PAD - action_dim)))

    return {
        "w1": w1.astype(jnp.bfloat16),
        "b1": b1,
        "w2": w2.astype(jnp.bfloat16),
        "b2": b2,
        "w3": w3.astype(jnp.bfloat16),
        "b3": b3,
    }


def reference_forward(x, params, action_dim):
    """Pure-JAX reference mirroring the kernel's bf16-operand / f32-accumulate math."""
    f32, bf16 = jnp.float32, jnp.bfloat16
    w1 = params["w1"].astype(f32)
    w2 = params["w2"].astype(f32)
    w3 = params["w3"].astype(f32)
    b1, b2, b3 = params["b1"], params["b2"], params["b3"]

    xb = x.astype(bf16).astype(f32)
    h1 = _leaky_relu(xb @ w1 + b1).astype(bf16).astype(f32)
    h2 = _leaky_relu(h1 @ w2 + b2).astype(bf16).astype(f32)
    z = h2 @ w3 + b3                      # w3/b3 already carry the 0.5 factor
    return jnp.tanh(z)[:, :action_dim]    # == 2*sigmoid(fc3(h2)) - 1


if __name__ == "__main__":
    key = jax.random.PRNGKey(0)
    k_params, k_x = jax.random.split(key)

    batch, state_dim, action_dim = 8, 16, 4
    params = init_params(k_params, state_dim, action_dim)
    x = jax.random.normal(k_x, (batch, state_dim), jnp.float32)

    out = policy_net_forward(x, params, action_dim)
    out = jax.block_until_ready(out)

    ref = reference_forward(x, params, action_dim)
    assert out.shape == (batch, action_dim)
    # bf16 output quantization (~4e-3 near |y|=1) plus bf16 matmul-path differences.
    assert jnp.allclose(out, ref, atol=1e-2, rtol=1e-2), float(jnp.max(jnp.abs(out - ref)))

    print("KERNEL_OK")
</pallas_src>

<mosaic_0001>
module attributes {stable_mosaic.version = 11 : i64} {
  func.func @policy_net_kernel(%arg0: i32, %arg1: memref<8x16xbf16, #tpu.memory_space<vmem>>, %arg2: memref<16x128xbf16, #tpu.memory_space<vmem>>, %arg3: memref<1x128xf32, #tpu.memory_space<vmem>>, %arg4: memref<128x256xbf16, #tpu.memory_space<vmem>>, %arg5: memref<1x256xf32, #tpu.memory_space<vmem>>, %arg6: memref<256x128xbf16, #tpu.memory_space<vmem>>, %arg7: memref<1x128xf32, #tpu.memory_space<vmem>>, %arg8: memref<8x128xbf16, #tpu.memory_space<vmem>>) attributes {dimension_semantics = [#tpu.dimension_semantics<parallel>], iteration_bounds = array<i64: 1>, scalar_prefetch = 0 : i64, scratch_operands = 0 : i64, tpu.core_type = #tpu.core_type<tc>, window_params = [{transform_indices = @transform_0, window_bounds = array<i64: 8, 16>}, {pipeline_mode = #tpu.pipeline_mode<synchronous>, transform_indices = @transform_1, window_bounds = array<i64: 16, 128>}, {pipeline_mode = #tpu.pipeline_mode<synchronous>, transform_indices = @transform_2, window_bounds = array<i64: 1, 128>}, {pipeline_mode = #tpu.pipeline_mode<synchronous>, transform_indices = @transform_3, window_bounds = array<i64: 128, 256>}, {pipeline_mode = #tpu.pipeline_mode<synchronous>, transform_indices = @transform_4, window_bounds = array<i64: 1, 256>}, {pipeline_mode = #tpu.pipeline_mode<synchronous>, transform_indices = @transform_5, window_bounds = array<i64: 256, 128>}, {pipeline_mode = #tpu.pipeline_mode<synchronous>, transform_indices = @transform_6, window_bounds = array<i64: 1, 128>}, {transform_indices = @transform_7, window_bounds = array<i64: 8, 128>}]} {
    %c0 = arith.constant 0 : index
    %c0_0 = arith.constant 0 : index
    %0 = vector.load %arg1[%c0, %c0_0] : memref<8x16xbf16, #tpu.memory_space<vmem>>, vector<8x16xbf16>
    %c0_1 = arith.constant 0 : index
    %c0_2 = arith.constant 0 : index
    %1 = vector.load %arg2[%c0_1, %c0_2] : memref<16x128xbf16, #tpu.memory_space<vmem>>, vector<16x128xbf16>
    %cst = arith.constant dense<0.000000e+00> : vector<8x128xf32>
    %2 = tpu.matmul %0, %1, %cst {dimension_numbers = #tpu.dot_dimension_numbers<[1], [0], [0], [1], [0, 0, 1, 1], [], []>} : vector<8x16xbf16>, vector<16x128xbf16>, vector<8x128xf32> -> vector<8x128xf32>
    %c0_3 = arith.constant 0 : index
    %c0_4 = arith.constant 0 : index
    %3 = vector.load %arg3[%c0_3, %c0_4] : memref<1x128xf32, #tpu.memory_space<vmem>>, vector<1x128xf32>
    %4 = vector.broadcast %3 : vector<1x128xf32> to vector<8x128xf32>
    %5 = arith.addf %2, %4 : vector<8x128xf32>
    %cst_5 = arith.constant 0.00999999977 : f32
    %6 = vector.broadcast %cst_5 : f32 to vector<8x128xf32>
    %7 = arith.mulf %6, %5 : vector<8x128xf32>
    %8 = arith.maximumf %5, %7 : vector<8x128xf32>
    %9 = arith.truncf %8 : vector<8x128xf32> to vector<8x128xbf16>
    %c0_6 = arith.constant 0 : index
    %c0_7 = arith.constant 0 : index
    %10 = vector.load %arg4[%c0_6, %c0_7] : memref<128x256xbf16, #tpu.memory_space<vmem>>, vector<128x256xbf16>
    %cst_8 = arith.constant dense<0.000000e+00> : vector<8x256xf32>
    %11 = tpu.matmul %9, %10, %cst_8 {dimension_numbers = #tpu.dot_dimension_numbers<[1], [0], [0], [1], [0, 0, 1, 1], [], []>} : vector<8x128xbf16>, vector<128x256xbf16>, vector<8x256xf32> -> vector<8x256xf32>
    %c0_9 = arith.constant 0 : index
    %c0_10 = arith.constant 0 : index
    %12 = vector.load %arg5[%c0_9, %c0_10] : memref<1x256xf32, #tpu.memory_space<vmem>>, vector<1x256xf32>
    %13 = vector.broadcast %12 : vector<1x256xf32> to vector<8x256xf32>
    %14 = arith.addf %11, %13 : vector<8x256xf32>
    %cst_11 = arith.constant 0.00999999977 : f32
    %15 = vector.broadcast %cst_11 : f32 to vector<8x256xf32>
    %16 = arith.mulf %15, %14 : vector<8x256xf32>
    %17 = arith.maximumf %14, %16 : vector<8x256xf32>
    %18 = arith.truncf %17 : vector<8x256xf32> to vector<8x256xbf16>
    %c0_12 = arith.constant 0 : index
    %c0_13 = arith.constant 0 : index
    %19 = vector.load %arg6[%c0_12, %c0_13] : memref<256x128xbf16, #tpu.memory_space<vmem>>, vector<256x128xbf16>
    %cst_14 = arith.constant dense<0.000000e+00> : vector<8x128xf32>
    %20 = tpu.matmul %18, %19, %cst_14 {dimension_numbers = #tpu.dot_dimension_numbers<[1], [0], [0], [1], [0, 0, 1, 1], [], []>} : vector<8x256xbf16>, vector<256x128xbf16>, vector<8x128xf32> -> vector<8x128xf32>
    %c0_15 = arith.constant 0 : index
    %c0_16 = arith.constant 0 : index
    %21 = vector.load %arg7[%c0_15, %c0_16] : memref<1x128xf32, #tpu.memory_space<vmem>>, vector<1x128xf32>
    %22 = vector.broadcast %21 : vector<1x128xf32> to vector<8x128xf32>
    %23 = arith.addf %20, %22 : vector<8x128xf32>
    %24 = math.tanh %23 : vector<8x128xf32>
    %25 = arith.truncf %24 : vector<8x128xf32> to vector<8x128xbf16>
    %c0_17 = arith.constant 0 : index
    %c0_18 = arith.constant 0 : index
    %26 = vector.load %arg8[%c0_17, %c0_18] : memref<8x128xbf16, #tpu.memory_space<vmem>>, vector<8x128xbf16>
    tpu.vector_store %arg8[%c0_17, %c0_18], %25 {strides = array<i32>} : memref<8x128xbf16, #tpu.memory_space<vmem>>, vector<8x128xbf16>,
    return
  }
  func.func @transform_0(%arg0: i32) -> (i32, i32) {
    %c0_i32 = arith.constant 0 : i32
    %c0_i32_0 = arith.constant 0 : i32
    return %arg0, %c0_i32 : i32, i32
  }
  func.func @transform_1(%arg0: i32) -> (i32, i32) {
    %c0_i32 = arith.constant 0 : i32
    %c0_i32_0 = arith.constant 0 : i32
    %c0_i32_1 = arith.constant 0 : i32
    return %c0_i32, %c0_i32_0 : i32, i32
  }
  func.func @transform_2(%arg0: i32) -> (i32, i32) {
    %c0_i32 = arith.constant 0 : i32
    %c0_i32_0 = arith.constant 0 : i32
    %c0_i32_1 = arith.constant 0 : i32
    return %c0_i32, %c0_i32_0 : i32, i32
  }
  func.func @transform_3(%arg0: i32) -> (i32, i32) {
    %c0_i32 = arith.constant 0 : i32
    %c0_i32_0 = arith.constant 0 : i32
    %c0_i32_1 = arith.constant 0 : i32
    return %c0_i32, %c0_i32_0 : i32, i32
  }
  func.func @transform_4(%arg0: i32) -> (i32, i32) {
    %c0_i32 = arith.constant 0 : i32
    %c0_i32_0 = arith.constant 0 : i32
    %c0_i32_1 = arith.constant 0 : i32
    return %c0_i32, %c0_i32_0 : i32, i32
  }
  func.func @transform_5(%arg0: i32) -> (i32, i32) {
    %c0_i32 = arith.constant 0 : i32
    %c0_i32_0 = arith.constant 0 : i32
    %c0_i32_1 = arith.constant 0 : i32
    return %c0_i32, %c0_i32_0 : i32, i32
  }
  func.func @transform_6(%arg0: i32) -> (i32, i32) {
    %c0_i32 = arith.constant 0 : i32
    %c0_i32_0 = arith.constant 0 : i32
    %c0_i32_1 = arith.constant 0 : i32
    return %c0_i32, %c0_i32_0 : i32, i32
  }
  func.func @transform_7(%arg0: i32) -> (i32, i32) {
    %c0_i32 = arith.constant 0 : i32
    %c0_i32_0 = arith.constant 0 : i32
    return %arg0, %c0_i32 : i32, i32
  }
}

module attributes {stable_mosaic.version = 11 : i64} {
  func.func @policy_net_kernel(%arg0: i32, %arg1: memref<8x16xbf16, #tpu.memory_space<vmem>>, %arg2: memref<16x128xbf16, #tpu.memory_space<vmem>>, %arg3: memref<1x128xf32, #tpu.memory_space<vmem>>, %arg4: memref<128x256xbf16, #tpu.memory_space<vmem>>, %arg5: memref<1x256xf32, #tpu.memory_space<vmem>>, %arg6: memref<256x128xbf16, #tpu.memory_space<vmem>>, %arg7: memref<1x128xf32, #tpu.memory_space<vmem>>, %arg8: memref<8x128xbf16, #tpu.memory_space<vmem>>) attributes {dimension_semantics = [#tpu.dimension_semantics<parallel>], iteration_bounds = array<i64: 1>, scalar_prefetch = 0 : i64, scratch_operands = 0 : i64, tpu.core_type = #tpu.core_type<tc>, window_params = [{transform_indices = @transform_0, window_bounds = array<i64: 8, 16>}, {pipeline_mode = #tpu.pipeline_mode<synchronous>, transform_indices = @transform_1, window_bounds = array<i64: 16, 128>}, {pipeline_mode = #tpu.pipeline_mode<synchronous>, transform_indices = @transform_2, window_bounds = array<i64: 1, 128>}, {pipeline_mode = #tpu.pipeline_mode<synchronous>, transform_indices = @transform_3, window_bounds = array<i64: 128, 256>}, {pipeline_mode = #tpu.pipeline_mode<synchronous>, transform_indices = @transform_4, window_bounds = array<i64: 1, 256>}, {pipeline_mode = #tpu.pipeline_mode<synchronous>, transform_indices = @transform_5, window_bounds = array<i64: 256, 128>}, {pipeline_mode = #tpu.pipeline_mode<synchronous>, transform_indices = @transform_6, window_bounds = array<i64: 1, 128>}, {transform_indices = @transform_7, window_bounds = array<i64: 8, 128>}]} {
    %c0 = arith.constant 0 : index
    %c0_0 = arith.constant 0 : index
    %0 = vector.load %arg1[%c0, %c0_0] : memref<8x16xbf16, #tpu.memory_space<vmem>>, vector<8x16xbf16>
    %c0_1 = arith.constant 0 : index
    %c0_2 = arith.constant 0 : index
    %1 = vector.load %arg2[%c0_1, %c0_2] : memref<16x128xbf16, #tpu.memory_space<vmem>>, vector<16x128xbf16>
    %cst = arith.constant dense<0.000000e+00> : vector<8x128xf32>
    %2 = tpu.matmul %0, %1, %cst {dimension_numbers = #tpu.dot_dimension_numbers<[1], [0], [0], [1], [0, 0, 1, 1], [], []>} : vector<8x16xbf16>, vector<16x128xbf16>, vector<8x128xf32> -> vector<8x128xf32>
    %c0_3 = arith.constant 0 : index
    %c0_4 = arith.constant 0 : index
    %3 = vector.load %arg3[%c0_3, %c0_4] : memref<1x128xf32, #tpu.memory_space<vmem>>, vector<1x128xf32>
    %4 = vector.broadcast %3 : vector<1x128xf32> to vector<8x128xf32>
    %5 = arith.addf %2, %4 : vector<8x128xf32>
    %cst_5 = arith.constant 0.00999999977 : f32
    %6 = vector.broadcast %cst_5 : f32 to vector<8x128xf32>
    %7 = arith.mulf %6, %5 : vector<8x128xf32>
    %8 = arith.maximumf %5, %7 : vector<8x128xf32>
    %9 = arith.truncf %8 : vector<8x128xf32> to vector<8x128xbf16>
    %c0_6 = arith.constant 0 : index
    %c0_7 = arith.constant 0 : index
    %10 = vector.load %arg4[%c0_6, %c0_7] : memref<128x256xbf16, #tpu.memory_space<vmem>>, vector<128x256xbf16>
    %cst_8 = arith.constant dense<0.000000e+00> : vector<8x256xf32>
    %11 = tpu.matmul %9, %10, %cst_8 {dimension_numbers = #tpu.dot_dimension_numbers<[1], [0], [0], [1], [0, 0, 1, 1], [], []>} : vector<8x128xbf16>, vector<128x256xbf16>, vector<8x256xf32> -> vector<8x256xf32>
    %c0_9 = arith.constant 0 : index
    %c0_10 = arith.constant 0 : index
    %12 = vector.load %arg5[%c0_9, %c0_10] : memref<1x256xf32, #tpu.memory_space<vmem>>, vector<1x256xf32>
    %13 = vector.broadcast %12 : vector<1x256xf32> to vector<8x256xf32>
    %14 = arith.addf %11, %13 : vector<8x256xf32>
    %cst_11 = arith.constant 0.00999999977 : f32
    %15 = vector.broadcast %cst_11 : f32 to vector<8x256xf32>
    %16 = arith.mulf %15, %14 : vector<8x256xf32>
    %17 = arith.maximumf %14, %16 : vector<8x256xf32>
    %18 = arith.truncf %17 : vector<8x256xf32> to vector<8x256xbf16>
    %c0_12 = arith.constant 0 : index
    %c0_13 = arith.constant 0 : index
    %19 = vector.load %arg6[%c0_12, %c0_13] : memref<256x128xbf16, #tpu.memory_space<vmem>>, vector<256x128xbf16>
    %cst_14 = arith.constant dense<0.000000e+00> : vector<8x128xf32>
    %20 = tpu.matmul %18, %19, %cst_14 {dimension_numbers = #tpu.dot_dimension_numbers<[1], [0], [0], [1], [0, 0, 1, 1], [], []>} : vector<8x256xbf16>, vector<256x128xbf16>, vector<8x128xf32> -> vector<8x128xf32>
    %c0_15 = arith.constant 0 : index
    %c0_16 = arith.constant 0 : index
    %21 = vector.load %arg7[%c0_15, %c0_16] : memref<1x128xf32, #tpu.memory_space<vmem>>, vector<1x128xf32>
    %22 = vector.broadcast %21 : vector<1x128xf32> to vector<8x128xf32>
    %23 = arith.addf %20, %22 : vector<8x128xf32>
    %24 = math.tanh %23 : vector<8x128xf32>
    %25 = arith.truncf %24 : vector<8x128xf32> to vector<8x128xbf16>
    %c0_17 = arith.constant 0 : index
    %c0_18 = arith.constant 0 : index
    %26 = vector.load %arg8[%c0_17, %c0_18] : memref<8x128xbf16, #tpu.memory_space<vmem>>, vector<8x128xbf16>
    tpu.vector_store %arg8[%c0_17, %c0_18], %25 {strides = array<i32>} : memref<8x128xbf16, #tpu.memory_space<vmem>>, vector<8x128xbf16>,
    return
  }
  func.func @transform_0(%arg0: i32) -> (i32, i32) {
    %c0_i32 = arith.constant 0 : i32
    %c0_i32_0 = arith.constant 0 : i32
    return %arg0, %c0_i32 : i32, i32
  }
  func.func @transform_1(%arg0: i32) -> (i32, i32) {
    %c0_i32 = arith.constant 0 : i32
    %c0_i32_0 = arith.constant 0 : i32
    %c0_i32_1 = arith.constant 0 : i32
    return %c0_i32, %c0_i32_0 : i32, i32
  }
  func.func @transform_2(%arg0: i32) -> (i32, i32) {
    %c0_i32 = arith.constant 0 : i32
    %c0_i32_0 = arith.constant 0 : i32
    %c0_i32_1 = arith.constant 0 : i32
    return %c0_i32, %c0_i32_0 : i32, i32
  }
  func.func @transform_3(%arg0: i32) -> (i32, i32) {
    %c0_i32 = arith.constant 0 : i32
    %c0_i32_0 = arith.constant 0 : i32
    %c0_i32_1 = arith.constant 0 : i32
    return %c0_i32, %c0_i32_0 : i32, i32
  }
  func.func @transform_4(%arg0: i32) -> (i32, i32) {
    %c0_i32 = arith.constant 0 : i32
    %c0_i32_0 = arith.constant 0 : i32
    %c0_i32_1 = arith.constant 0 : i32
    return %c0_i32, %c0_i32_0 : i32, i32
  }
  func.func @transform_5(%arg0: i32) -> (i32, i32) {
    %c0_i32 = arith.constant 0 : i32
    %c0_i32_0 = arith.constant 0 : i32
    %c0_i32_1 = arith.constant 0 : i32
    return %c0_i32, %c0_i32_0 : i32, i32
  }
  func.func @transform_6(%arg0: i32) -> (i32, i32) {
    %c0_i32 = arith.constant 0 : i32
    %c0_i32_0 = arith.constant 0 : i32
    %c0_i32_1 = arith.constant 0 : i32
    return %c0_i32, %c0_i32_0 : i32, i32
  }
  func.func @transform_7(%arg0: i32) -> (i32, i32) {
    %c0_i32 = arith.constant 0 : i32
    %c0_i32_0 = arith.constant 0 : i32
    return %arg0, %c0_i32 : i32, i32
  }
}

</mosaic_0001>

<bundles_post_ra>
// kernel: tpu_custom_call.1
= control target key start
LH: loop header
LB: loop body
LE: loop exit
PB: predicated region body
PF: predicated region fallthrough
CT: control target
= control target key end

     0   :  { %12 = vsyncpa [#allocation3], 0  ;;  %s805_s0 = inlined_call_operand.hbm [shape: bf16[8,16], index: 0, kind: input, shape index: {}]   ;;  %s806_s1 = inlined_call_operand.hbm [shape: bf16[16,128], index: 1, kind: input, shape index: {}]   ;;  %s807_s2 = inlined_call_operand.vmem [shape: f32[1,128], index: 2, kind: input, shape index: {}]   ;;  %s808_s3 = inlined_call_operand.hbm [shape: bf16[128,256], index: 3, kind: input, shape index: {}]   ;;  %s809_s4 = inlined_call_operand.vmem [shape: f32[1,256], index: 4, kind: input, shape index: {}]   ;;  %s810_s5 = inlined_call_operand.hbm [shape: bf16[256,128], index: 5, kind: input, shape index: {}]   ;;  %s811_s6 = inlined_call_operand.vmem [shape: f32[1,128], index: 6, kind: input, shape index: {}]   ;;  %s812_s7 = inlined_call_operand.hbm [shape: bf16[8,128], index: 7, kind: output, shape index: {}]  }
   0x1   :  { %13 = vsyncpa [#allocation6], 0 }
   0x2   :  { %14 = vsyncpa [#allocation9], 0 }
   0x3   :  { %15 = vsyncpa [#allocation4], 0  ;;  %s723_s24 = smov [#allocation5]  }
   0x4   :  { %s31_s25 = sshll.u32 %s723_s24, 4  ;;  %s32_s25 = int_to_ptr.vmem [resolvable:$true] %s31_s25 }
   0x5   :  { %s623_s26 = scalar_lea.vmem %s32_s25, 128  ;;  %p628_p1 = scmp.lt.s32.totalorder %s32_s25, %s32_s25 }
   0x6   :  { %p624_p0 = scmp.ne.s32.totalorder %s32_s25, %s623_s26  ;;  %p629_p2 = scmp.lt.s32.totalorder %s623_s26, %s623_s26 }
   0x8   :  { %p630_p3 = por %p629_p2, %p628_p1 }
   0xa   :  { %p631_p4 = pnand %p630_p3, %p624_p0 }
   0xc   :  { %634 = shalt.err (!%p631_p4)
}
   0xd   :  { %s724_s27 = smov 64   ;;  %s725_s28 = smov 4  }
   0xe   :  { %37 = dma.hbm_to_vmem [thread:$0]  %s806_s1, 128, %s32_s25, [#allocation6], %s724_s27, %s724_s27, %s725_s28  }
   0xf   :  { %s726_s8 = smov [#allocation2]   ;;  %s727_s10 = smov [#allocation7]  }
  0x10   :  { %s22_s9 = sshll.u32 %s726_s8, 4  ;;  %s45_s11 = sshll.u32 %s727_s10, 4  ;;  %s23_s9 = int_to_ptr.vmem [resolvable:$true] %s22_s9  ;;  %s46_s11 = int_to_ptr.vmem [resolvable:$true] %s45_s11 }
  0x11   :  { %s643_s12 = scalar_lea.vmem %s23_s9, 64  ;;  %p648_p6 = scmp.lt.s32.totalorder %s23_s9, %s23_s9 }
  0x12   :  { %p644_p5 = scmp.ne.s32.totalorder %s23_s9, %s643_s12  ;;  %p649_p7 = scmp.lt.s32.totalorder %s643_s12, %s643_s12 }
  0x14   :  { %p650_p8 = por %p649_p7, %p648_p6 }
  0x16   :  { %p651_p9 = pnand %p650_p8, %p644_p5 }
  0x18   :  { %654 = shalt.err (!%p651_p9)
}
  0x19   :  { %25 = dma.hbm_to_vmem [thread:$0]  %s805_s0, 64, %s23_s9, [#allocation3]  }
  0x1a   :  { %s663_s15 = scalar_lea.vmem %s46_s11, 2048  ;;  %p668_p11 = scmp.lt.s32.totalorder %s46_s11, %s46_s11 }
  0x1b   :  { %p664_p10 = scmp.ne.s32.totalorder %s46_s11, %s663_s15  ;;  %p669_p12 = scmp.lt.s32.totalorder %s663_s15, %s663_s15 }
  0x1d   :  { %p670_p13 = por %p669_p12, %p668_p11 }
  0x1f   :  { %p671_p0 = pnand %p670_p13, %p664_p10 }
  0x21   :  { %674 = shalt.err (!%p671_p0)
}
  0x22   :  { %s728_s1 = smov 128   ;;  %s729_s16 = smov 8  }
  0x23   :  { %51 = dma.hbm_to_vmem [thread:$0]  %s808_s3, 2048, %s46_s11, [#allocation6], %s728_s1, %s728_s1, %s729_s16  }
  0x24   :  { %s730_s19 = smov [#allocation8]  }
  0x25   :  { %s59_s20 = sshll.u32 %s730_s19, 4  ;;  %s60_s20 = int_to_ptr.vmem [resolvable:$true] %s59_s20 }
  0x26   :  { %s683_s21 = scalar_lea.vmem %s60_s20, 2048  ;;  %p688_p2 = scmp.lt.s32.totalorder %s60_s20, %s60_s20 }
  0x27   :  { %p684_p1 = scmp.ne.s32.totalorder %s60_s20, %s683_s21  ;;  %p689_p3 = scmp.lt.s32.totalorder %s683_s21, %s683_s21 }
  0x29   :  { %p690_p4 = por %p689_p3, %p688_p2 }
  0x2b   :  { %p691_p5 = pnand %p690_p4, %p684_p1 }
  0x2d   :  { %694 = shalt.err (!%p691_p5)
}
  0x2e   :  { %65 = dma.hbm_to_vmem [thread:$0]  %s810_s5, 2048, %s60_s20, [#allocation9], %s724_s27, %s724_s27, %s725_s28  }
  0x2f   :  { %715 = dma.done.wait [#allocation3], 64  }
  0x30   :  { %716 = vsyncadd [#allocation3], 4294967232 }
  0x31   :  { %717 = dma.done.wait [#allocation6], 2176  }
  0x32   :  { %718 = vsyncadd [#allocation6], 4294965120 }
  0x33   :  { %719 = dma.done.wait [#allocation9], 2048  }
  0x34   :  { %720 = vsyncadd [#allocation9], 4294965248  ;;  %v731_v0 = vmov 0.0   ;;  %vm732_vm0 = vmmov 0   ;;  %v572_v1 = vld [vmem:[#allocation5] sm:$0xff]   ;;  %vm97_vm1 = vcmask 130048   ;;  %v162_v45 = vlaneseq }
  0x35   :  { %554 = vmatprep.subr.bf16.mxu0 %v731_v0  ;;  %556 = vmatprep.mubr.msk.bf16.mxu0 %vm732_vm0, %v731_v0  ;;  %v81_v2 = vld [vmem:[#allocation2] sm:$0xf]  ;;  %v575_v4 = vld [vmem:[#allocation7 + $0x70] ss:$8 sps:$4 sm:$0xff]   ;;  %v576_v5 = vld [vmem:[#allocation7 + $0x64] ss:$8 sps:$4 sm:$0xff]  }
  0x36   :  { %555 = vmatpush3.bf16.msra.mxu0 %v572_v1  ;;  %v573_v3 = vld [vmem:[#allocation7 + $0x74] ss:$8 sps:$4 sm:$0xff]   ;;  %v578_v6 = vld [vmem:[#allocation7 + $0x60] ss:$8 sps:$4 sm:$0xff]   ;;  %v581_v8 = vld [vmem:[#allocation7 + $0x50] ss:$8 sps:$4 sm:$0xff]  }
  0x37   :  { %252 = vmatprep.subr.bf16.mxu1 %v573_v3  ;;  %v579_v7 = vld [vmem:[#allocation7 + $0x54] ss:$8 sps:$4 sm:$0xff]   ;;  %v582_v9 = vld [vmem:[#allocation7 + $0x44] ss:$8 sps:$4 sm:$0xff]   ;;  %v584_v10 = vld [vmem:[#allocation7 + $0x40] ss:$8 sps:$4 sm:$0xff]  }
  0x38   :  { %253 = vmatpush1.bf16.msra.mxu1 %v575_v4  ;;  %v585_v11 = vld [vmem:[#allocation7 + $0x34] ss:$8 sps:$4 sm:$0xff]   ;;  %v587_v12 = vld [vmem:[#allocation7 + $0x30] ss:$8 sps:$4 sm:$0xff]   ;;  %v588_v13 = vld [vmem:[#allocation7 + $0x24] ss:$8 sps:$4 sm:$0xff]  }
  0x39   :  { %557 = vmatmul.mubr.msk.bf16.vlgmr.msra.gmra.mxu0 %vm97_vm1, %v81_v2  ;;  %254 = vmatprep.subr.bf16.mxu1 %v576_v5  ;;  %v590_v14 = vld [vmem:[#allocation7 + $0x20] ss:$8 sps:$4 sm:$0xff]   ;;  %v591_v15 = vld [vmem:[#allocation7 + $0x14] ss:$8 sps:$4 sm:$0xff]   ;;  %v593_v16 = vld [vmem:[#allocation7 + $0x10] ss:$8 sps:$4 sm:$0xff]  }
  0x3a   :  { %v594_v17 = vld [vmem:[#allocation7 + $0x4] ss:$8 sps:$4 sm:$0xff]   ;;  %v596_v18 = vld [vmem:[#allocation7] ss:$8 sps:$4 sm:$0xff]   ;;  %v733_v19 = vmov 0   ;;  %v597_v20 = vld [vmem:[#allocation8 + $0x78] sm:$0xff]  }
  0x3b   :  { %284 = vmatprep.mubr.bf16.mxu1 %v733_v19  ;;  %v598_v21 = vld [vmem:[#allocation8 + $0x38] sm:$0xff]   ;;  %v599_v22 = vld [vmem:[#allocation8 + $0x70] sm:$0xff]   ;;  %532 = vmatprep.subr.bf16.mxu0 %v597_v20  ;;  %v601_v24 = vld [vmem:[#allocation8 + $0x68] sm:$0xff]   ;;  %v163_v46 = vshrl.u32 %v162_v45, 7  ;;  %s734_s25 = smov [#allocation10]  }
  0x3c   :  { %255 = vmatpush1.bf16.msra.mxu1 %v578_v6  ;;  %533 = vmatpush3.bf16.msra.mxu0 %v598_v21  ;;  %v600_v23 = vld [vmem:[#allocation8 + $0x30] sm:$0xff]   ;;  %v602_v25 = vld [vmem:[#allocation8 + $0x28] sm:$0xff]   ;;  %v603_v26 = vld [vmem:[#allocation8 + $0x60] sm:$0xff]   ;;  %s483_s26 = sshll.u32 %s734_s25, 4  ;;  %s484_s26 = int_to_ptr.vmem [resolvable:$true] %s483_s26 }
  0x3d   :  { %256 = vmatprep.subr.bf16.mxu1 %v579_v7  ;;  %534 = vmatprep.subr.bf16.mxu0 %v599_v22  ;;  %v604_v27 = vld [vmem:[#allocation8 + $0x20] sm:$0xff]   ;;  %v605_v28 = vld [vmem:[#allocation8 + $0x58] sm:$0xff]   ;;  %v494_v30 = vld [vmem:[%s807_s2] ss:$0 sm:$0xff]  ;;  %v164_v47 = vsub.s32 0, %v163_v46  ;;  %v168_v49 = vsub.s32 1, %v163_v46  ;;  %p700_p7 = scmp.lt.s32.totalorder %s484_s26, %s484_s26 }
  0x3e   :  { %v606_v29 = vld [vmem:[#allocation8 + $0x18] sm:$0xff]   ;;  %v607_v39 = vld [vmem:[#allocation8 + $0x50] sm:$0xff]   ;;  %v609_v41 = vld [vmem:[#allocation8 + $0x48] sm:$0xff]   ;;  %s695_s27 = scalar_lea.vmem %s484_s26, 64 }
  0x3f   :  { %v608_v40 = vld [vmem:[#allocation8 + $0x10] sm:$0xff]   ;;  %v610_v42 = vld [vmem:[#allocation8 + $0x8] sm:$0xff]   ;;  %v611_v43 = vld [vmem:[#allocation8 + $0x40] sm:$0xff]   ;;  %p696_p6 = scmp.ne.s32.totalorder %s484_s26, %s695_s27  ;;  %p701_p8 = scmp.lt.s32.totalorder %s695_s27, %s695_s27 }
  0x40   :  { %257 = vmatpush1.bf16.msra.mxu1 %v581_v8  ;;  %535 = vmatpush3.bf16.msra.mxu0 %v600_v23  ;;  %v612_v44 = vld [vmem:[#allocation8] sm:$0xff]   ;;  %v160_v48 = vld [vmem:[%s809_s4] sm:$0x3] }
  0x41   :  { %258 = vmatprep.subr.bf16.mxu1 %v582_v9  ;;  %536 = vmatprep.subr.bf16.mxu0 %v601_v24  ;;  %v165_v50 = vrot.slane %v160_v48, %v164_v47  ;;  %v169_v51 = vrot.slane %v160_v48, %v168_v49  ;;  %v513_v1 = vld [vmem:[%s811_s6] ss:$0 sm:$0xff]  ;;  %p702_p9 = por %p701_p8, %p700_p7 }
  0x43   :  { %p703_p10 = pnand %p702_p9, %p696_p6 }
  0x44   :  { %259 = vmatpush1.bf16.msra.mxu1 %v584_v10  ;;  %537 = vmatpush3.bf16.msra.mxu0 %v602_v25 }
  0x45   :  { %260 = vmatprep.subr.bf16.mxu1 %v585_v11  ;;  %538 = vmatprep.subr.bf16.mxu0 %v603_v26 }
  0x48   :  { %261 = vmatpush1.bf16.msra.mxu1 %v587_v12  ;;  %539 = vmatpush3.bf16.msra.mxu0 %v604_v27 }
  0x49   :  { %262 = vmatprep.subr.bf16.mxu1 %v588_v13  ;;  %540 = vmatprep.subr.bf16.mxu0 %v605_v28 }
  0x4c   :  { %263 = vmatpush1.bf16.msra.mxu1 %v590_v14  ;;  %541 = vmatpush3.bf16.msra.mxu0 %v606_v29 }
  0x4d   :  { %264 = vmatprep.subr.bf16.mxu1 %v591_v15  ;;  %542 = vmatprep.subr.bf16.mxu0 %v607_v39 }
  0x50   :  { %265 = vmatpush1.bf16.msra.mxu1 %v593_v16  ;;  %543 = vmatpush3.bf16.msra.mxu0 %v608_v40 }
  0x51   :  { %266 = vmatprep.subr.bf16.mxu1 %v594_v17  ;;  %544 = vmatprep.subr.bf16.mxu0 %v609_v41 }
  0x54   :  { %267 = vmatpush1.bf16.msra.mxu1 %v596_v18  ;;  %545 = vmatpush3.bf16.msra.mxu0 %v610_v42 }
  0x55   :  { %546 = vmatprep.subr.bf16.mxu0 %v611_v43 }
  0x58   :  { %547 = vmatpush3.bf16.msra.mxu0 %v612_v44 }
  0xf9   :  { %v135_v31 = vpop.f32.mrf.mxu0 }
  0xfa   :  { %v136_v32 = vadd.f32 %v494_v30, %v135_v31 }
  0xfb   :  { %v558_v33 = vpop.f32.mrf.mxu0 }
  0xfc   :  { %v141_v34 = vmul.f32 0.01, %v136_v32 }
  0xfd   :  { %v138_v35 = vpop.f32.mrf.mxu0 }
  0xfe   :  { %v142_v36 = vmax.f32 %v136_v32, %v141_v34 }
  0xff   :  { %v559_v37 = vpop.f32.mrf.mxu0 }
 0x100   :  { %v143_v38 = vpack.c.bf16 %v142_v36, %v142_v36 }
 0x102   :  { %285 = vmatmul.mubr.bf16.vlgmr.msra.gmra.mxu1 %v143_v38 }
 0x1c2   :  { %v286_v52 = vpop.f32.mrf.mxu1 }
 0x1c3   :  { %v287_v53 = vadd.f32 %v286_v52, %v165_v50 }
 0x1c4   :  { %v288_v54 = vpop.f32.mrf.mxu1 }
 0x1c5   :  { %v293_v55 = vmul.f32 0.01, %v287_v53  ;;  %v289_v56 = vadd.f32 %v288_v54, %v169_v51 }
 0x1c6   :  { %v290_v57 = vpop.f32.mrf.mxu1 }
 0x1c7   :  { %v294_v58 = vmul.f32 0.01, %v289_v56  ;;  %v295_v59 = vmax.f32 %v287_v53, %v293_v55 }
 0x1c8   :  { %v291_v60 = vpop.f32.mrf.mxu1 }
 0x1c9   :  { %v296_v61 = vmax.f32 %v289_v56, %v294_v58  ;;  %v297_v63 = vpack.c.bf16 %v295_v59, %v295_v59 }
 0x1cb   :  { %v298_v62 = vpack.c.bf16 %v296_v61, %v296_v61 }
 0x1cd   :  { %466 = vmatprep.mubr.bf16.mxu0 %v298_v62 }
 0x1ce   :  { %467 = vmatmul.mubr.bf16.vlgmr.msra.gmra.mxu0 %v297_v63 }
 0x28e   :  { %v548_v0 = vpop.f32.mrf.mxu0 }
 0x290   :  { %v549_v2 = vpop.f32.mrf.mxu0 }
 0x291   :  { %v550_v3 = vadd.f32 %v549_v2, %v548_v0 }
 0x292   :  { %v551_v4 = vpop.f32.mrf.mxu0 }
 0x293   :  { %v469_v5 = vadd.f32 %v550_v3, %v513_v1 }
 0x294   :  { %v552_v6 = vpop.f32.mrf.mxu0 }
 0x295   :  { %613 = vtanh.f32 %v469_v5 }
 0x2a2   :  { %v614_v7 = vpop.eup %613 }
 0x2a3   :  { %v475_v8 = vpack.c.bf16 %v614_v7, %v614_v7 }
 0x2a5   :  { %476 = vst [vmem:[#allocation10] sm:$0xf] %v475_v8 }
 0x2a6   :  { %706 = shalt.err (!%p703_p10)
}
 0x2a7   :  { %486 = dma.vmem_to_hbm [thread:$0]  %s484_s26, 64, %s812_s7, [#allocation4]  }
 0x2a8   :  { %721 = dma.done.wait [#allocation4], 64  }
 0x2a9   :  { %722 = vsyncadd [#allocation4], 4294967232 }
 0x2aa   :  { %490 = vsyncpa [#allocation3], 1 }
 0x2ab   :  { %491 = vsyncpa [#allocation6], 1 }
 0x2ac   :  { %492 = vsyncpa [#allocation9], 1 }
 0x2ad   :  { %493 = vsyncpa [#allocation4], 1 }

// kernel: tpu_custom_call.1
= control target key start
LH: loop header
LB: loop body
LE: loop exit
PB: predicated region body
PF: predicated region fallthrough
CT: control target
= control target key end

     0   :  { %12 = vsyncpa [#allocation3], 0  ;;  %s805_s0 = inlined_call_operand.hbm [shape: bf16[8,16], index: 0, kind: input, shape index: {}]   ;;  %s806_s1 = inlined_call_operand.hbm [shape: bf16[16,128], index: 1, kind: input, shape index: {}]   ;;  %s807_s2 = inlined_call_operand.vmem [shape: f32[1,128], index: 2, kind: input, shape index: {}]   ;;  %s808_s3 = inlined_call_operand.hbm [shape: bf16[128,256], index: 3, kind: input, shape index: {}]   ;;  %s809_s4 = inlined_call_operand.vmem [shape: f32[1,256], index: 4, kind: input, shape index: {}]   ;;  %s810_s5 = inlined_call_operand.hbm [shape: bf16[256,128], index: 5, kind: input, shape index: {}]   ;;  %s811_s6 = inlined_call_operand.vmem [shape: f32[1,128], index: 6, kind: input, shape index: {}]   ;;  %s812_s7 = inlined_call_operand.hbm [shape: bf16[8,128], index: 7, kind: output, shape index: {}]  }
   0x1   :  { %13 = vsyncpa [#allocation6], 0 }
   0x2   :  { %14 = vsyncpa [#allocation9], 0 }
   0x3   :  { %15 = vsyncpa [#allocation4], 0  ;;  %s723_s24 = smov [#allocation5]  }
   0x4   :  { %s31_s25 = sshll.u32 %s723_s24, 4  ;;  %s32_s25 = int_to_ptr.vmem [resolvable:$true] %s31_s25 }
   0x5   :  { %s623_s26 = scalar_lea.vmem %s32_s25, 128  ;;  %p628_p1 = scmp.lt.s32.totalorder %s32_s25, %s32_s25 }
   0x6   :  { %p624_p0 = scmp.ne.s32.totalorder %s32_s25, %s623_s26  ;;  %p629_p2 = scmp.lt.s32.totalorder %s623_s26, %s623_s26 }
   0x8   :  { %p630_p3 = por %p629_p2, %p628_p1 }
   0xa   :  { %p631_p4 = pnand %p630_p3, %p624_p0 }
   0xc   :  { %634 = shalt.err (!%p631_p4)
}
   0xd   :  { %s724_s27 = smov 64   ;;  %s725_s28 = smov 4  }
   0xe   :  { %37 = dma.hbm_to_vmem [thread:$0]  %s806_s1, 128, %s32_s25, [#allocation6], %s724_s27, %s724_s27, %s725_s28  }
   0xf   :  { %s726_s8 = smov [#allocation2]   ;;  %s727_s10 = smov [#allocation7]  }
  0x10   :  { %s22_s9 = sshll.u32 %s726_s8, 4  ;;  %s45_s11 = sshll.u32 %s727_s10, 4  ;;  %s23_s9 = int_to_ptr.vmem [resolvable:$true] %s22_s9  ;;  %s46_s11 = int_to_ptr.vmem [resolvable:$true] %s45_s11 }
  0x11   :  { %s643_s12 = scalar_lea.vmem %s23_s9, 64  ;;  %p648_p6 = scmp.lt.s32.totalorder %s23_s9, %s23_s9 }
  0x12   :  { %p644_p5 = scmp.ne.s32.totalorder %s23_s9, %s643_s12  ;;  %p649_p7 = scmp.lt.s32.totalorder %s643_s12, %s643_s12 }
  0x14   :  { %p650_p8 = por %p649_p7, %p648_p6 }
  0x16   :  { %p651_p9 = pnand %p650_p8, %p644_p5 }
  0x18   :  { %654 = shalt.err (!%p651_p9)
}
  0x19   :  { %25 = dma.hbm_to_vmem [thread:$0]  %s805_s0, 64, %s23_s9, [#allocation3]  }
  0x1a   :  { %s663_s15 = scalar_lea.vmem %s46_s11, 2048  ;;  %p668_p11 = scmp.lt.s32.totalorder %s46_s11, %s46_s11 }
  0x1b   :  { %p664_p10 = scmp.ne.s32.totalorder %s46_s11, %s663_s15  ;;  %p669_p12 = scmp.lt.s32.totalorder %s663_s15, %s663_s15 }
  0x1d   :  { %p670_p13 = por %p669_p12, %p668_p11 }
  0x1f   :  { %p671_p0 = pnand %p670_p13, %p664_p10 }
  0x21   :  { %674 = shalt.err (!%p671_p0)
}
  0x22   :  { %s728_s1 = smov 128   ;;  %s729_s16 = smov 8  }
  0x23   :  { %51 = dma.hbm_to_vmem [thread:$0]  %s808_s3, 2048, %s46_s11, [#allocation6], %s728_s1, %s728_s1, %s729_s16  }
  0x24   :  { %s730_s19 = smov [#allocation8]  }
  0x25   :  { %s59_s20 = sshll.u32 %s730_s19, 4  ;;  %s60_s20 = int_to_ptr.vmem [resolvable:$true] %s59_s20 }
  0x26   :  { %s683_s21 = scalar_lea.vmem %s60_s20, 2048  ;;  %p688_p2 = scmp.lt.s32.totalorder %s60_s20, %s60_s20 }
  0x27   :  { %p684_p1 = scmp.ne.s32.totalorder %s60_s20, %s683_s21  ;;  %p689_p3 = scmp.lt.s32.totalorder %s683_s21, %s683_s21 }
  0x29   :  { %p690_p4 = por %p689_p3, %p688_p2 }
  0x2b   :  { %p691_p5 = pnand %p690_p4, %p684_p1 }
  0x2d   :  { %694 = shalt.err (!%p691_p5)
}
  0x2e   :  { %65 = dma.hbm_to_vmem [thread:$0]  %s810_s5, 2048, %s60_s20, [#allocation9], %s724_s27, %s724_s27, %s725_s28  }
  0x2f   :  { %715 = dma.done.wait [#allocation3], 64  }
  0x30   :  { %716 = vsyncadd [#allocation3], 4294967232 }
  0x31   :  { %717 = dma.done.wait [#allocation6], 2176  }
  0x32   :  { %718 = vsyncadd [#allocation6], 4294965120 }
  0x33   :  { %719 = dma.done.wait [#allocation9], 2048  }
  0x34   :  { %720 = vsyncadd [#allocation9], 4294965248  ;;  %v731_v0 = vmov 0.0   ;;  %vm732_vm0 = vmmov 0   ;;  %v572_v1 = vld [vmem:[#allocation5] sm:$0xff]   ;;  %vm97_vm1 = vcmask 130048   ;;  %v162_v45 = vlaneseq }
  0x35   :  { %554 = vmatprep.subr.bf16.mxu0 %v731_v0  ;;  %556 = vmatprep.mubr.msk.bf16.mxu0 %vm732_vm0, %v731_v0  ;;  %v81_v2 = vld [vmem:[#allocation2] sm:$0xf]  ;;  %v575_v4 = vld [vmem:[#allocation7 + $0x70] ss:$8 sps:$4 sm:$0xff]   ;;  %v576_v5 = vld [vmem:[#allocation7 + $0x64] ss:$8 sps:$4 sm:$0xff]  }
  0x36   :  { %555 = vmatpush3.bf16.msra.mxu0 %v572_v1  ;;  %v573_v3 = vld [vmem:[#allocation7 + $0x74] ss:$8 sps:$4 sm:$0xff]   ;;  %v578_v6 = vld [vmem:[#allocation7 + $0x60] ss:$8 sps:$4 sm:$0xff]   ;;  %v581_v8 = vld [vmem:[#allocation7 + $0x50] ss:$8 sps:$4 sm:$0xff]  }
  0x37   :  { %252 = vmatprep.subr.bf16.mxu1 %v573_v3  ;;  %v579_v7 = vld [vmem:[#allocation7 + $0x54] ss:$8 sps:$4 sm:$0xff]   ;;  %v582_v9 = vld [vmem:[#allocation7 + $0x44] ss:$8 sps:$4 sm:$0xff]   ;;  %v584_v10 = vld [vmem:[#allocation7 + $0x40] ss:$8 sps:$4 sm:$0xff]  }
  0x38   :  { %253 = vmatpush1.bf16.msra.mxu1 %v575_v4  ;;  %v585_v11 = vld [vmem:[#allocation7 + $0x34] ss:$8 sps:$4 sm:$0xff]   ;;  %v587_v12 = vld [vmem:[#allocation7 + $0x30] ss:$8 sps:$4 sm:$0xff]   ;;  %v588_v13 = vld [vmem:[#allocation7 + $0x24] ss:$8 sps:$4 sm:$0xff]  }
  0x39   :  { %557 = vmatmul.mubr.msk.bf16.vlgmr.msra.gmra.mxu0 %vm97_vm1, %v81_v2  ;;  %254 = vmatprep.subr.bf16.mxu1 %v576_v5  ;;  %v590_v14 = vld [vmem:[#allocation7 + $0x20] ss:$8 sps:$4 sm:$0xff]   ;;  %v591_v15 = vld [vmem:[#allocation7 + $0x14] ss:$8 sps:$4 sm:$0xff]   ;;  %v593_v16 = vld [vmem:[#allocation7 + $0x10] ss:$8 sps:$4 sm:$0xff]  }
  0x3a   :  { %v594_v17 = vld [vmem:[#allocation7 + $0x4] ss:$8 sps:$4 sm:$0xff]   ;;  %v596_v18 = vld [vmem:[#allocation7] ss:$8 sps:$4 sm:$0xff]   ;;  %v733_v19 = vmov 0   ;;  %v597_v20 = vld [vmem:[#allocation8 + $0x78] sm:$0xff]  }
  0x3b   :  { %284 = vmatprep.mubr.bf16.mxu1 %v733_v19  ;;  %v598_v21 = vld [vmem:[#allocation8 + $0x38] sm:$0xff]   ;;  %v599_v22 = vld [vmem:[#allocation8 + $0x70] sm:$0xff]   ;;  %532 = vmatprep.subr.bf16.mxu0 %v597_v20  ;;  %v601_v24 = vld [vmem:[#allocation8 + $0x68] sm:$0xff]   ;;  %v163_v46 = vshrl.u32 %v162_v45, 7  ;;  %s734_s25 = smov [#allocation10]  }
  0x3c   :  { %255 = vmatpush1.bf16.msra.mxu1 %v578_v6  ;;  %533 = vmatpush3.bf16.msra.mxu0 %v598_v21  ;;  %v600_v23 = vld [vmem:[#allocation8 + $0x30] sm:$0xff]   ;;  %v602_v25 = vld [vmem:[#allocation8 + $0x28] sm:$0xff]   ;;  %v603_v26 = vld [vmem:[#allocation8 + $0x60] sm:$0xff]   ;;  %s483_s26 = sshll.u32 %s734_s25, 4  ;;  %s484_s26 = int_to_ptr.vmem [resolvable:$true] %s483_s26 }
  0x3d   :  { %256 = vmatprep.subr.bf16.mxu1 %v579_v7  ;;  %534 = vmatprep.subr.bf16.mxu0 %v599_v22  ;;  %v604_v27 = vld [vmem:[#allocation8 + $0x20] sm:$0xff]   ;;  %v605_v28 = vld [vmem:[#allocation8 + $0x58] sm:$0xff]   ;;  %v494_v30 = vld [vmem:[%s807_s2] ss:$0 sm:$0xff]  ;;  %v164_v47 = vsub.s32 0, %v163_v46  ;;  %v168_v49 = vsub.s32 1, %v163_v46  ;;  %p700_p7 = scmp.lt.s32.totalorder %s484_s26, %s484_s26 }
  0x3e   :  { %v606_v29 = vld [vmem:[#allocation8 + $0x18] sm:$0xff]   ;;  %v607_v39 = vld [vmem:[#allocation8 + $0x50] sm:$0xff]   ;;  %v609_v41 = vld [vmem:[#allocation8 + $0x48] sm:$0xff]   ;;  %s695_s27 = scalar_lea.vmem %s484_s26, 64 }
  0x3f   :  { %v608_v40 = vld [vmem:[#allocation8 + $0x10] sm:$0xff]   ;;  %v610_v42 = vld [vmem:[#allocation8 + $0x8] sm:$0xff]   ;;  %v611_v43 = vld [vmem:[#allocation8 + $0x40] sm:$0xff]   ;;  %p696_p6 = scmp.ne.s32.totalorder %s484_s26, %s695_s27  ;;  %p701_p8 = scmp.lt.s32.totalorder %s695_s27, %s695_s27 }
  0x40   :  { %257 = vmatpush1.bf16.msra.mxu1 %v581_v8  ;;  %535 = vmatpush3.bf16.msra.mxu0 %v600_v23  ;;  %v612_v44 = vld [vmem:[#allocation8] sm:$0xff]   ;;  %v160_v48 = vld [vmem:[%s809_s4] sm:$0x3] }
  0x41   :  { %258 = vmatprep.subr.bf16.mxu1 %v582_v9  ;;  %536 = vmatprep.subr.bf16.mxu0 %v601_v24  ;;  %v165_v50 = vrot.slane %v160_v48, %v164_v47  ;;  %v169_v51 = vrot.slane %v160_v48, %v168_v49  ;;  %v513_v1 = vld [vmem:[%s811_s6] ss:$0 sm:$0xff]  ;;  %p702_p9 = por %p701_p8, %p700_p7 }
  0x43   :  { %p703_p10 = pnand %p702_p9, %p696_p6 }
  0x44   :  { %259 = vmatpush1.bf16.msra.mxu1 %v584_v10  ;;  %537 = vmatpush3.bf16.msra.mxu0 %v602_v25 }
  0x45   :  { %260 = vmatprep.subr.bf16.mxu1 %v585_v11  ;;  %538 = vmatprep.subr.bf16.mxu0 %v603_v26 }
  0x48   :  { %261 = vmatpush1.bf16.msra.mxu1 %v587_v12  ;;  %539 = vmatpush3.bf16.msra.mxu0 %v604_v27 }
  0x49   :  { %262 = vmatprep.subr.bf16.mxu1 %v588_v13  ;;  %540 = vmatprep.subr.bf16.mxu0 %v605_v28 }
  0x4c   :  { %263 = vmatpush1.bf16.msra.mxu1 %v590_v14  ;;  %541 = vmatpush3.bf16.msra.mxu0 %v606_v29 }
  0x4d   :  { %264 = vmatprep.subr.bf16.mxu1 %v591_v15  ;;  %542 = vmatprep.subr.bf16.mxu0 %v607_v39 }
  0x50   :  { %265 = vmatpush1.bf16.msra.mxu1 %v593_v16  ;;  %543 = vmatpush3.bf16.msra.mxu0 %v608_v40 }
  0x51   :  { %266 = vmatprep.subr.bf16.mxu1 %v594_v17  ;;  %544 = vmatprep.subr.bf16.mxu0 %v609_v41 }
  0x54   :  { %267 = vmatpush1.bf16.msra.mxu1 %v596_v18  ;;  %545 = vmatpush3.bf16.msra.mxu0 %v610_v42 }
  0x55   :  { %546 = vmatprep.subr.bf16.mxu0 %v611_v43 }
  0x58   :  { %547 = vmatpush3.bf16.msra.mxu0 %v612_v44 }
  0xf9   :  { %v135_v31 = vpop.f32.mrf.mxu0 }
  0xfa   :  { %v136_v32 = vadd.f32 %v494_v30, %v135_v31 }
  0xfb   :  { %v558_v33 = vpop.f32.mrf.mxu0 }
  0xfc   :  { %v141_v34 = vmul.f32 0.01, %v136_v32 }
  0xfd   :  { %v138_v35 = vpop.f32.mrf.mxu0 }
  0xfe   :  { %v142_v36 = vmax.f32 %v136_v32, %v141_v34 }
  0xff   :  { %v559_v37 = vpop.f32.mrf.mxu0 }
 0x100   :  { %v143_v38 = vpack.c.bf16 %v142_v36, %v142_v36 }
 0x102   :  { %285 = vmatmul.mubr.bf16.vlgmr.msra.gmra.mxu1 %v143_v38 }
 0x1c2   :  { %v286_v52 = vpop.f32.mrf.mxu1 }
 0x1c3   :  { %v287_v53 = vadd.f32 %v286_v52, %v165_v50 }
 0x1c4   :  { %v288_v54 = vpop.f32.mrf.mxu1 }
 0x1c5   :  { %v293_v55 = vmul.f32 0.01, %v287_v53  ;;  %v289_v56 = vadd.f32 %v288_v54, %v169_v51 }
 0x1c6   :  { %v290_v57 = vpop.f32.mrf.mxu1 }
 0x1c7   :  { %v294_v58 = vmul.f32 0.01, %v289_v56  ;;  %v295_v59 = vmax.f32 %v287_v53, %v293_v55 }
 0x1c8   :  { %v291_v60 = vpop.f32.mrf.mxu1 }
 0x1c9   :  { %v296_v61 = vmax.f32 %v289_v56, %v294_v58  ;;  %v297_v63 = vpack.c.bf16 %v295_v59, %v295_v59 }
 0x1cb   :  { %v298_v62 = vpack.c.bf16 %v296_v61, %v296_v61 }
 0x1cd   :  { %466 = vmatprep.mubr.bf16.mxu0 %v298_v62 }
 0x1ce   :  { %467 = vmatmul.mubr.bf16.vlgmr.msra.gmra.mxu0 %v297_v63 }
 0x28e   :  { %v548_v0 = vpop.f32.mrf.mxu0 }
 0x290   :  { %v549_v2 = vpop.f32.mrf.mxu0 }
 0x291   :  { %v550_v3 = vadd.f32 %v549_v2, %v548_v0 }
 0x292   :  { %v551_v4 = vpop.f32.mrf.mxu0 }
 0x293   :  { %v469_v5 = vadd.f32 %v550_v3, %v513_v1 }
 0x294   :  { %v552_v6 = vpop.f32.mrf.mxu0 }
 0x295   :  { %613 = vtanh.f32 %v469_v5 }
 0x2a2   :  { %v614_v7 = vpop.eup %613 }
 0x2a3   :  { %v475_v8 = vpack.c.bf16 %v614_v7, %v614_v7 }
 0x2a5   :  { %476 = vst [vmem:[#allocation10] sm:$0xf] %v475_v8 }
 0x2a6   :  { %706 = shalt.err (!%p703_p10)
}
 0x2a7   :  { %486 = dma.vmem_to_hbm [thread:$0]  %s484_s26, 64, %s812_s7, [#allocation4]  }
 0x2a8   :  { %721 = dma.done.wait [#allocation4], 64  }
 0x2a9   :  { %722 = vsyncadd [#allocation4], 4294967232 }
 0x2aa   :  { %490 = vsyncpa [#allocation3], 1 }
 0x2ab   :  { %491 = vsyncpa [#allocation6], 1 }
 0x2ac   :  { %492 = vsyncpa [#allocation9], 1 }
 0x2ad   :  { %493 = vsyncpa [#allocation4], 1 }

</bundles_post_ra>
